<compile_context>
chip_gen: v5e
topology: v5e:2x2
jax: 0.10.0
libtpu: 0.0.40
codegen_flags: <defaults>
</compile_context>

<pallas_src>
import functools

import jax
import jax.numpy as jnp
from jax.experimental import pallas as pl
from jax.experimental.pallas import tpu as pltpu

K_HOPS = 10
ALPHA = 0.1
LANES = 128   # lane (feature) padding granularity
# Node-row tile. 128 is safe on every generation (v5e MXU is 4x128^2); raise to
# 256 on v6e/v7x after re-deriving the VMEM budget (v7x has only 64 MiB).
TM = 128


def _round_up(v, m):
    return (v + m - 1) // m * m


def _vmem_capacity_bytes():
    try:
        return int(pltpu.get_tpu_info().vmem_capacity_bytes)
    except Exception:
        return 64 * 1024 * 1024   # conservative fallback (v7x per-core VMEM)


# --------------------------------------------------------------------------
# Resident path: A' stays in VMEM, hop loops are in-kernel, h stays f32.
# --------------------------------------------------------------------------
def _resident_kernel(x_ref, w1_ref, b1_ref, w2_ref, b2_ref, a_ref, o_ref,
                     h_ref, z0_ref, *, k_hops, alpha):
    # ---- layer 1: linear ----
    h0 = jnp.dot(x_ref[...], w1_ref[...],
                 preferred_element_type=jnp.float32) + b1_ref[...]
    h_ref[...] = h0
    z0_ref[...] = alpha * h0

    # ---- layer 1: K-step propagation (A' resident in VMEM, h kept f32) ----
    @pl.loop(0, k_hops)
    def _(_):
        h_ref[...] = (jnp.dot(a_ref[...], h_ref[...].astype(a_ref.dtype),
                              preferred_element_type=jnp.float32)
                      + z0_ref[...])

    # ---- ReLU + layer 2: linear ----
    h_relu = jnp.maximum(h_ref[...], 0.0)
    h0 = jnp.dot(h_relu.astype(w2_ref.dtype), w2_ref[...],
                 preferred_element_type=jnp.float32) + b2_ref[...]
    h_ref[...] = h0
    z0_ref[...] = alpha * h0

    # ---- layer 2: K-step propagation ----
    @pl.loop(0, k_hops)
    def _(_):
        h_ref[...] = (jnp.dot(a_ref[...], h_ref[...].astype(a_ref.dtype),
                              preferred_element_type=jnp.float32)
                      + z0_ref[...])

    o_ref[...] = h_ref[...].astype(o_ref.dtype)


# --------------------------------------------------------------------------
# Streamed path: grid = (step, row_tile), A' row strips streamed from HBM.
# --------------------------------------------------------------------------
def _streamed_kernel(x_ref, w1_ref, b1_ref, w2_ref, b2_ref, a_ref, o_ref,
                     h_buf, z0_ref, *, k_hops, alpha, tm):
    """Fused 2-layer APPNP with streamed A' row strips.

    Steps:
      step 0            : h0_1 = x @ W1 + b1            (layer-1 linear)
      steps 1..K        : h    = A' @ h + alpha*h0_1    (layer-1 propagation)
      step K+1          : h0_2 = relu(h) @ W2 + b2      (ReLU + layer-2 linear)
      steps K+2..2K+1   : h    = A' @ h + alpha*h0_2    (layer-2 propagation)
    A' = (1-alpha)*gcn_norm(A), pre-scaled outside the kernel.
    The h state ping-pongs: every step reads slot s%2 and writes slot 1-s%2,
    so there is no end-of-hop copy.  The output is written only on the last
    step (and only then does the out BlockSpec advance its block index).
    """
    s = pl.program_id(0)
    i = pl.program_id(1)
    last = pl.num_programs(0) - 1
    row0 = pl.multiple_of(i * tm, tm)
    rows = pl.ds(row0, tm)
    src = jax.lax.rem(s, 2)
    dst = 1 - src

    @pl.when(s == 0)
    def _():
        h0 = jnp.dot(x_ref[...], w1_ref[...],
                     preferred_element_type=jnp.float32) + b1_ref[...]
        z0_ref[rows, :] = alpha * h0
        h_buf[dst, rows, :] = h0.astype(h_buf.dtype)

    @pl.when(s == k_hops + 1)
    def _():
        h_relu = jnp.maximum(h_buf[src, rows, :].astype(jnp.float32), 0.0)
        h0 = jnp.dot(h_relu.astype(w2_ref.dtype), w2_ref[...],
                     preferred_element_type=jnp.float32) + b2_ref[...]
        z0_ref[rows, :] = alpha * h0
        h_buf[dst, rows, :] = h0.astype(h_buf.dtype)

    is_prop = jnp.logical_and(s != 0, s != k_hops + 1)

    @pl.when(is_prop)
    def _():
        h_new = (jnp.dot(a_ref[...], h_buf[src],
                         preferred_element_type=jnp.float32)
                 + z0_ref[rows, :])
        h_buf[dst, rows, :] = h_new.astype(h_buf.dtype)

        @pl.when(s == last)
        def _():
            o_ref[...] = h_new.astype(o_ref.dtype)


# --------------------------------------------------------------------------
# Graph preprocessing (done once, outside the jitted forward).
# --------------------------------------------------------------------------
def build_propagation_matrix(edge_index, num_nodes):
    """(1 - alpha) * D^-1/2 (A + I) D^-1/2, dense bf16.  Built once (cached)."""
    src, dst = edge_index[0], edge_index[1]
    adj = jnp.zeros((num_nodes, num_nodes), jnp.float32)
    adj = adj.at[src, dst].add(1.0)                      # scatter-ADD (PyG gcn_norm)
    adj = adj + jnp.eye(num_nodes, dtype=jnp.float32)    # add self loops
    deg = adj.sum(axis=1)
    d_inv_sqrt = jnp.where(deg > 0.0, jax.lax.rsqrt(deg), 0.0)
    a_hat = d_inv_sqrt[:, None] * adj * d_inv_sqrt[None, :]
    return ((1.0 - ALPHA) * a_hat).astype(jnp.bfloat16)


# --------------------------------------------------------------------------
# Wrapper.
# --------------------------------------------------------------------------
@functools.partial(jax.jit, static_argnames=("out_channels", "force_streamed"))
def appnp_encoder(x, a_scaled, params, *, out_channels, force_streamed=False):
    n, f_in = x.shape
    hid = params["w1"].shape[1]
    fdim = _round_up(max(hid, out_channels), LANES)   # shared padded feature width
    f_in_pad = _round_up(f_in, LANES)
    n_pad = _round_up(n, TM)
    num_tiles = n_pad // TM

    # Zero-pad everything to lane-dense shapes; padded rows/cols of A' are zero
    # so padded nodes never contaminate real ones.
    x_p = jnp.zeros((n_pad, f_in_pad), jnp.bfloat16).at[:n, :f_in].set(
        x.astype(jnp.bfloat16))
    w1_p = jnp.zeros((f_in_pad, fdim), jnp.bfloat16).at[:f_in, :hid].set(
        params["w1"].astype(jnp.bfloat16))
    b1_p = jnp.zeros((1, fdim), jnp.float32).at[0, :hid].set(params["b1"])
    w2_p = jnp.zeros((fdim, fdim), jnp.bfloat16).at[:hid, :out_channels].set(
        params["w2"].astype(jnp.bfloat16))
    b2_p = jnp.zeros((1, fdim), jnp.float32).at[0, :out_channels].set(params["b2"])
    a_p = jnp.zeros((n_pad, n_pad), jnp.bfloat16).at[:n, :n].set(a_scaled)

    cap = _vmem_capacity_bytes()
    flops = (2 * n_pad * f_in_pad * fdim + 2 * n_pad * fdim * fdim
             + 2 * K_HOPS * 2 * n_pad * n_pad * fdim)

    # Footprint of the resident path (everything in VMEM at once, no buffering).
    resident_bytes = (n_pad * n_pad * 2               # A' (bf16)
                      + n_pad * f_in_pad * 2          # x (bf16)
                      + n_pad * fdim * 4              # output (f32)
                      + 2 * n_pad * fdim * 4          # h + alpha*h0 scratch (f32)
                      + f_in_pad * fdim * 2 + fdim * fdim * 2 + 2 * fdim * 4)
    use_resident = (not force_streamed) and resident_bytes <= int(0.6 * cap)

    if use_resident:
        kernel = functools.partial(_resident_kernel, k_hops=K_HOPS, alpha=ALPHA)
        cost = pl.CostEstimate(flops=flops, transcendentals=0,
                               bytes_accessed=resident_bytes)
        out = pl.pallas_call(
            kernel,
            out_shape=jax.ShapeDtypeStruct((n_pad, fdim), jnp.float32),
            scratch_shapes=[
                pltpu.VMEM((n_pad, fdim), jnp.float32),   # h (f32 across all hops)
                pltpu.VMEM((n_pad, fdim), jnp.float32),   # alpha * h0
            ],
            compiler_params=pltpu.CompilerParams(
                vmem_limit_bytes=int(min(0.9 * cap, resident_bytes + (16 << 20)))),
            cost_estimate=cost,
        )(x_p, w1_p, b1_p, w2_p, b2_p, a_p)
        return out[:n, :out_channels]

    # ---------------- streamed path ----------------
    num_steps = 2 * K_HOPS + 2
    last_step = num_steps - 1
    kernel = functools.partial(_streamed_kernel, k_hops=K_HOPS, alpha=ALPHA, tm=TM)

    def x_map(s, i):                       # x is only consumed at step 0
        return (jnp.where(s == 0, i, 0), 0)

    def a_map(s, i):                       # no A' fetch on the two linear steps
        lin = jnp.logical_or(s == 0, s == K_HOPS + 1)
        return (jnp.where(lin, 0, i), 0)

    def o_map(s, i):                       # write back only on the final step
        return (jnp.where(s == last_step, i, 0), 0)

    block_bytes = 2 * (TM * f_in_pad * 2 + TM * n_pad * 2 + TM * fdim * 4)
    const_bytes = 2 * (f_in_pad * fdim * 2 + fdim * fdim * 2 + 2 * fdim * 4)
    scratch_bytes = n_pad * fdim * (2 * 2 + 4)     # bf16 ping-pong h + f32 z0
    vmem_needed = block_bytes + const_bytes + scratch_bytes
    vmem_limit = int(min(0.9 * cap, vmem_needed + (16 << 20)))

    bytes_accessed = (2 * K_HOPS * n_pad * n_pad * 2   # A' streamed once per hop
                      + n_pad * f_in_pad * 2           # x once
                      + n_pad * fdim * 4               # output once
                      + f_in_pad * fdim * 2 + fdim * fdim * 2)
    cost = pl.CostEstimate(flops=flops, transcendentals=0,
                           bytes_accessed=bytes_accessed)

    out = pl.pallas_call(
        kernel,
        out_shape=jax.ShapeDtypeStruct((n_pad, fdim), jnp.float32),
        grid_spec=pltpu.PrefetchScalarGridSpec(
            num_scalar_prefetch=0,
            grid=(num_steps, num_tiles),
            in_specs=[
                pl.BlockSpec((TM, f_in_pad), x_map),                   # x
                pl.BlockSpec((f_in_pad, fdim), lambda s, i: (0, 0)),   # W1
                pl.BlockSpec((1, fdim), lambda s, i: (0, 0)),          # b1
                pl.BlockSpec((fdim, fdim), lambda s, i: (0, 0)),       # W2
                pl.BlockSpec((1, fdim), lambda s, i: (0, 0)),          # b2
                pl.BlockSpec((TM, n_pad), a_map),                      # A' row strip
            ],
            out_specs=pl.BlockSpec((TM, fdim), o_map),
            scratch_shapes=[
                pltpu.VMEM((2, n_pad, fdim), jnp.bfloat16),  # h ping-pong state
                pltpu.VMEM((n_pad, fdim), jnp.float32),      # alpha * h0 (f32)
            ],
        ),
        compiler_params=pltpu.CompilerParams(
            # Row-tile axis must stay "arbitrary": every tile of hop t reads
            # the full resident h written by all tiles of hop t-1, and megacore
            # TensorCores do not share VMEM scratch.
            dimension_semantics=("arbitrary", "arbitrary"),
            vmem_limit_bytes=vmem_limit,
        ),
        cost_estimate=cost,
    )(x_p, w1_p, b1_p, w2_p, b2_p, a_p)
    return out[:n, :out_channels]


# --------------------------------------------------------------------------
# Reference / demo.
# --------------------------------------------------------------------------
def glorot(key, shape):
    fan_in, fan_out = shape
    limit = jnp.sqrt(6.0 / (fan_in + fan_out))
    return jax.random.uniform(key, shape, jnp.float32, -limit, limit)


def _reference(x, edge_index, params):
    """Pure-JAX f32 reference of the same forward pass (sanity check)."""
    n = x.shape[0]
    src, dst = edge_index[0], edge_index[1]
    adj = jnp.zeros((n, n), jnp.float32).at[src, dst].add(1.0)
    adj = adj + jnp.eye(n, dtype=jnp.float32)
    deg = adj.sum(axis=1)
    dis = jnp.where(deg > 0, 1.0 / jnp.sqrt(deg), 0.0)
    a_hat = dis[:, None] * adj * dis[None, :]

    def layer(h_in, w, b):
        h0 = h_in @ w + b
        h = h0
        for _ in range(K_HOPS):
            h = (1.0 - ALPHA) * (a_hat @ h) + ALPHA * h0
        return h

    h = jax.nn.relu(layer(x, params["w1"], params["b1"]))
    return layer(h, params["w2"], params["b2"])


if __name__ == "__main__":
    key = jax.random.PRNGKey(0)
    k_x, k_w1, k_w2, k_e = jax.random.split(key, 4)

    num_nodes = 64
    in_channels = 16
    out_channels = 8
    hidden = 2 * out_channels  # 16

    # Node features.
    x = jax.random.normal(k_x, (num_nodes, in_channels), jnp.float32)

    # Deterministic graph: ring edges (both directions) + symmetric random chords.
    idx = jnp.arange(num_nodes, dtype=jnp.int32)
    ring_src = jnp.concatenate([idx, (idx + 1) % num_nodes])
    ring_dst = jnp.concatenate([(idx + 1) % num_nodes, idx])
    rand_src = jax.random.randint(k_e, (32,), 0, num_nodes, jnp.int32)
    rand_dst = jnp.flip(rand_src)
    edge_index = jnp.stack(
        [jnp.concatenate([ring_src, rand_src, rand_dst]),
         jnp.concatenate([ring_dst, rand_dst, rand_src])], axis=0)

    # Parameters (Glorot-uniform weights, zero bias), as implied by
    # APPNP(in_channels, 2*out_channels) / APPNP(2*out_channels, out_channels).
    params = {
        "w1": glorot(k_w1, (in_channels, hidden)),
        "b1": jnp.zeros((hidden,), jnp.float32),
        "w2": glorot(k_w2, (hidden, out_channels)),
        "b2": jnp.zeros((out_channels,), jnp.float32),
    }

    # gcn_norm is deterministic for a static graph: build + (1-alpha)-scale +
    # bf16-cast once, outside the jitted forward (cached).
    a_scaled = build_propagation_matrix(edge_index, num_nodes)

    z_ref = _reference(x, edge_index, params)

    # Path 1: resident A' + in-kernel hop loops (auto-selected for this size).
    z1 = appnp_encoder(x, a_scaled, params, out_channels=out_channels)
    jax.block_until_ready(z1)
    assert z1.shape == (num_nodes, out_channels)
    assert bool(jnp.all(jnp.isfinite(z1)))
    err1 = float(jnp.max(jnp.abs(z1 - z_ref)))
    assert err1 < 0.25, f"resident path: max abs error vs f32 reference too large: {err1}"

    # Path 2: streamed row-strip kernel (exercised explicitly so both code
    # paths are validated on hardware).
    z2 = appnp_encoder(x, a_scaled, params, out_channels=out_channels,
                       force_streamed=True)
    jax.block_until_ready(z2)
    assert z2.shape == (num_nodes, out_channels)
    assert bool(jnp.all(jnp.isfinite(z2)))
    err2 = float(jnp.max(jnp.abs(z2 - z_ref)))
    assert err2 < 0.25, f"streamed path: max abs error vs f32 reference too large: {err2}"

    print("KERNEL_OK")
</pallas_src>

<mosaic_0001>
module attributes {stable_mosaic.version = 11 : i64} {
  func.func @_resident_kernel(%arg0: memref<128x128xbf16, #tpu.memory_space<vmem>>, %arg1: memref<128x128xbf16, #tpu.memory_space<vmem>>, %arg2: memref<1x128xf32, #tpu.memory_space<vmem>>, %arg3: memref<128x128xbf16, #tpu.memory_space<vmem>>, %arg4: memref<1x128xf32, #tpu.memory_space<vmem>>, %arg5: memref<128x128xbf16, #tpu.memory_space<vmem>>, %arg6: memref<128x128xf32, #tpu.memory_space<vmem>>, %arg7: memref<128x128xf32, #tpu.memory_space<vmem>>, %arg8: memref<128x128xf32, #tpu.memory_space<vmem>>) attributes {dimension_semantics = [], scalar_prefetch = 0 : i64, scratch_operands = 2 : i64, tpu.core_type = #tpu.core_type<tc>} {
    %c0 = arith.constant 0 : index
    %c0_0 = arith.constant 0 : index
    %0 = vector.load %arg0[%c0, %c0_0] : memref<128x128xbf16, #tpu.memory_space<vmem>>, vector<128x128xbf16>
    %c0_1 = arith.constant 0 : index
    %c0_2 = arith.constant 0 : index
    %1 = vector.load %arg1[%c0_1, %c0_2] : memref<128x128xbf16, #tpu.memory_space<vmem>>, vector<128x128xbf16>
    %cst = arith.constant dense<0.000000e+00> : vector<128x128xf32>
    %2 = tpu.matmul %0, %1, %cst {dimension_numbers = #tpu.dot_dimension_numbers<[1], [0], [0], [1], [0, 0, 1, 1], [], []>} : vector<128x128xbf16>, vector<128x128xbf16>, vector<128x128xf32> -> vector<128x128xf32>
    %c0_3 = arith.constant 0 : index
    %c0_4 = arith.constant 0 : index
    %3 = vector.load %arg2[%c0_3, %c0_4] : memref<1x128xf32, #tpu.memory_space<vmem>>, vector<1x128xf32>
    %4 = vector.broadcast %3 : vector<1x128xf32> to vector<128x128xf32>
    %5 = arith.addf %2, %4 : vector<128x128xf32>
    %c0_5 = arith.constant 0 : index
    %c0_6 = arith.constant 0 : index
    %6 = vector.load %arg7[%c0_5, %c0_6] : memref<128x128xf32, #tpu.memory_space<vmem>>, vector<128x128xf32>
    tpu.vector_store %arg7[%c0_5, %c0_6], %5 {strides = array<i32>} : memref<128x128xf32, #tpu.memory_space<vmem>>, vector<128x128xf32>,
    %cst_7 = arith.constant 1.000000e-01 : f32
    %7 = vector.broadcast %cst_7 : f32 to vector<128x128xf32>
    %8 = arith.mulf %7, %5 : vector<128x128xf32>
    %c0_8 = arith.constant 0 : index
    %c0_9 = arith.constant 0 : index
    %9 = vector.load %arg8[%c0_8, %c0_9] : memref<128x128xf32, #tpu.memory_space<vmem>>, vector<128x128xf32>
    tpu.vector_store %arg8[%c0_8, %c0_9], %8 {strides = array<i32>} : memref<128x128xf32, #tpu.memory_space<vmem>>, vector<128x128xf32>,
    %c0_i32 = arith.constant 0 : i32
    %c10_i32 = arith.constant 10 : i32
    %10 = arith.addi %c0_i32, %c10_i32 : i32
    %c1_i32 = arith.constant 1 : i32
    scf.for %arg9 = %c0_i32 to %10 step %c1_i32  : i32 {
      %c0_30 = arith.constant 0 : index
      %c0_31 = arith.constant 0 : index
      %27 = vector.load %arg5[%c0_30, %c0_31] : memref<128x128xbf16, #tpu.memory_space<vmem>>, vector<128x128xbf16>
      %c0_32 = arith.constant 0 : index
      %c0_33 = arith.constant 0 : index
      %28 = vector.load %arg7[%c0_32, %c0_33] : memref<128x128xf32, #tpu.memory_space<vmem>>, vector<128x128xf32>
      %29 = arith.truncf %28 : vector<128x128xf32> to vector<128x128xbf16>
      %cst_34 = arith.constant dense<0.000000e+00> : vector<128x128xf32>
      %30 = tpu.matmul %27, %29, %cst_34 {dimension_numbers = #tpu.dot_dimension_numbers<[1], [0], [0], [1], [0, 0, 1, 1], [], []>} : vector<128x128xbf16>, vector<128x128xbf16>, vector<128x128xf32> -> vector<128x128xf32>
      %c0_35 = arith.constant 0 : index
      %c0_36 = arith.constant 0 : index
      %31 = vector.load %arg8[%c0_35, %c0_36] : memref<128x128xf32, #tpu.memory_space<vmem>>, vector<128x128xf32>
      %32 = arith.addf %30, %31 : vector<128x128xf32>
      %c0_37 = arith.constant 0 : index
      %c0_38 = arith.constant 0 : index
      %33 = vector.load %arg7[%c0_37, %c0_38] : memref<128x128xf32, #tpu.memory_space<vmem>>, vector<128x128xf32>
      tpu.vector_store %arg7[%c0_37, %c0_38], %32 {strides = array<i32>} : memref<128x128xf32, #tpu.memory_space<vmem>>, vector<128x128xf32>,
    }
    %c0_10 = arith.constant 0 : index
    %c0_11 = arith.constant 0 : index
    %11 = vector.load %arg7[%c0_10, %c0_11] : memref<128x128xf32, #tpu.memory_space<vmem>>, vector<128x128xf32>
    %cst_12 = arith.constant 0.000000e+00 : f32
    %12 = vector.broadcast %cst_12 : f32 to vector<128x128xf32>
    %13 = arith.maximumf %11, %12 : vector<128x128xf32>
    %14 = arith.truncf %13 : vector<128x128xf32> to vector<128x128xbf16>
    %c0_13 = arith.constant 0 : index
    %c0_14 = arith.constant 0 : index
    %15 = vector.load %arg3[%c0_13, %c0_14] : memref<128x128xbf16, #tpu.memory_space<vmem>>, vector<128x128xbf16>
    %cst_15 = arith.constant dense<0.000000e+00> : vector<128x128xf32>
    %16 = tpu.matmul %14, %15, %cst_15 {dimension_numbers = #tpu.dot_dimension_numbers<[1], [0], [0], [1], [0, 0, 1, 1], [], []>} : vector<128x128xbf16>, vector<128x128xbf16>, vector<128x128xf32> -> vector<128x128xf32>
    %c0_16 = arith.constant 0 : index
    %c0_17 = arith.constant 0 : index
    %17 = vector.load %arg4[%c0_16, %c0_17] : memref<1x128xf32, #tpu.memory_space<vmem>>, vector<1x128xf32>
    %18 = vector.broadcast %17 : vector<1x128xf32> to vector<128x128xf32>
    %19 = arith.addf %16, %18 : vector<128x128xf32>
    %c0_18 = arith.constant 0 : index
    %c0_19 = arith.constant 0 : index
    %20 = vector.load %arg7[%c0_18, %c0_19] : memref<128x128xf32, #tpu.memory_space<vmem>>, vector<128x128xf32>
    tpu.vector_store %arg7[%c0_18, %c0_19], %19 {strides = array<i32>} : memref<128x128xf32, #tpu.memory_space<vmem>>, vector<128x128xf32>,
    %cst_20 = arith.constant 1.000000e-01 : f32
    %21 = vector.broadcast %cst_20 : f32 to vector<128x128xf32>
    %22 = arith.mulf %21, %19 : vector<128x128xf32>
    %c0_21 = arith.constant 0 : index
    %c0_22 = arith.constant 0 : index
    %23 = vector.load %arg8[%c0_21, %c0_22] : memref<128x128xf32, #tpu.memory_space<vmem>>, vector<128x128xf32>
    tpu.vector_store %arg8[%c0_21, %c0_22], %22 {strides = array<i32>} : memref<128x128xf32, #tpu.memory_space<vmem>>, vector<128x128xf32>,
    %c0_i32_23 = arith.constant 0 : i32
    %c10_i32_24 = arith.constant 10 : i32
    %24 = arith.addi %c0_i32_23, %c10_i32_24 : i32
    %c1_i32_25 = arith.constant 1 : i32
    scf.for %arg9 = %c0_i32_23 to %24 step %c1_i32_25  : i32 {
      %c0_30 = arith.constant 0 : index
      %c0_31 = arith.constant 0 : index
      %27 = vector.load %arg5[%c0_30, %c0_31] : memref<128x128xbf16, #tpu.memory_space<vmem>>, vector<128x128xbf16>
      %c0_32 = arith.constant 0 : index
      %c0_33 = arith.constant 0 : index
      %28 = vector.load %arg7[%c0_32, %c0_33] : memref<128x128xf32, #tpu.memory_space<vmem>>, vector<128x128xf32>
      %29 = arith.truncf %28 : vector<128x128xf32> to vector<128x128xbf16>
      %cst_34 = arith.constant dense<0.000000e+00> : vector<128x128xf32>
      %30 = tpu.matmul %27, %29, %cst_34 {dimension_numbers = #tpu.dot_dimension_numbers<[1], [0], [0], [1], [0, 0, 1, 1], [], []>} : vector<128x128xbf16>, vector<128x128xbf16>, vector<128x128xf32> -> vector<128x128xf32>
      %c0_35 = arith.constant 0 : index
      %c0_36 = arith.constant 0 : index
      %31 = vector.load %arg8[%c0_35, %c0_36] : memref<128x128xf32, #tpu.memory_space<vmem>>, vector<128x128xf32>
      %32 = arith.addf %30, %31 : vector<128x128xf32>
      %c0_37 = arith.constant 0 : index
      %c0_38 = arith.constant 0 : index
      %33 = vector.load %arg7[%c0_37, %c0_38] : memref<128x128xf32, #tpu.memory_space<vmem>>, vector<128x128xf32>
      tpu.vector_store %arg7[%c0_37, %c0_38], %32 {strides = array<i32>} : memref<128x128xf32, #tpu.memory_space<vmem>>, vector<128x128xf32>,
    }
    %c0_26 = arith.constant 0 : index
    %c0_27 = arith.constant 0 : index
    %25 = vector.load %arg7[%c0_26, %c0_27] : memref<128x128xf32, #tpu.memory_space<vmem>>, vector<128x128xf32>
    %c0_28 = arith.constant 0 : index
    %c0_29 = arith.constant 0 : index
    %26 = vector.load %arg6[%c0_28, %c0_29] : memref<128x128xf32, #tpu.memory_space<vmem>>, vector<128x128xf32>
    tpu.vector_store %arg6[%c0_28, %c0_29], %25 {strides = array<i32>} : memref<128x128xf32, #tpu.memory_space<vmem>>, vector<128x128xf32>,
    return
  }
}

</mosaic_0001>

<bundles_post_ra>
// kernel: appnp_encoder.1
= control target key start
LH: loop header
LB: loop body
LE: loop exit
PB: predicated region body
PF: predicated region fallthrough
CT: control target
= control target key end

     0   :  { %s1444_s1 = inlined_call_operand.vmem [shape: bf16[128,128], index: 1, kind: input, shape index: {}]   ;;  %s1445_s3 = inlined_call_operand.vmem [shape: bf16[128,128], index: 3, kind: input, shape index: {}]   ;;  %s1446_s4 = inlined_call_operand.vmem [shape: f32[1,128], index: 4, kind: input, shape index: {}]   ;;  %s1447_s5 = inlined_call_operand.vmem [shape: bf16[128,128], index: 5, kind: input, shape index: {}]   ;;  %s1448_s6 = inlined_call_operand.vmem [shape: f32[128,128], index: 6, kind: output, shape index: {}]   ;;  %s1449_s2 = inlined_call_operand.vmem [shape: f32[1,128], index: 2, kind: input, shape index: {}]   ;;  %s1450_s0 = inlined_call_operand.vmem [shape: bf16[128,128], index: 0, kind: input, shape index: {}]  }
   0x1   :  { %v1028_v0 = vld [vmem:[%s1444_s1 + $0x38] sm:$0xff]  ;;  %v1027_v1 = vld [vmem:[%s1444_s1 + $0x30] sm:$0xff]  ;;  %v1026_v2 = vld [vmem:[%s1444_s1 + $0x28] sm:$0xff] }
   0x2   :  { %155 = vmatpush.bf16.msra.mxu0 %v1028_v0  ;;  %1053 = vmatpush.bf16.msra.mxu1 %v1028_v0  ;;  %v1025_v3 = vld [vmem:[%s1444_s1 + $0x20] sm:$0xff]  ;;  %v1024_v4 = vld [vmem:[%s1444_s1 + $0x18] sm:$0xff]  ;;  %v1023_v5 = vld [vmem:[%s1444_s1 + $0x10] sm:$0xff] }
   0x3   :  { %1054 = vmatpush.bf16.msra.mxu2 %v1028_v0  ;;  %1055 = vmatpush.bf16.msra.mxu3 %v1028_v0  ;;  %v1022_v6 = vld [vmem:[%s1444_s1 + $0x8] sm:$0xff]  ;;  %v1021_v7 = vld [vmem:[%s1444_s1] sm:$0xff]  ;;  %v1015_v9 = vld [vmem:[%s1450_s0 + $0x10] sm:$0xff] }
   0x4   :  { %v1013_v8 = vld [vmem:[%s1450_s0] sm:$0xff]  ;;  %v1019_v11 = vld [vmem:[%s1450_s0 + $0x30] sm:$0xff]  ;;  %v1014_v12 = vld [vmem:[%s1450_s0 + $0x8] sm:$0xff] }
   0x5   :  { %v1017_v10 = vld [vmem:[%s1450_s0 + $0x20] sm:$0xff]  ;;  %v1016_v13 = vld [vmem:[%s1450_s0 + $0x18] sm:$0xff]  ;;  %v1018_v14 = vld [vmem:[%s1450_s0 + $0x28] sm:$0xff] }
   0x6   :  { %156 = vmatpush.bf16.msra.mxu0 %v1027_v1  ;;  %1056 = vmatpush.bf16.msra.mxu1 %v1027_v1  ;;  %v1020_v15 = vld [vmem:[%s1450_s0 + $0x38] sm:$0xff]  ;;  %v1269_v16 = vld [vmem:[%s1449_s2] ss:$0 sm:$0xff]  ;;  %s1287_s0 = smov 0  }
   0x7   :  { %1057 = vmatpush.bf16.msra.mxu2 %v1027_v1  ;;  %1058 = vmatpush.bf16.msra.mxu3 %v1027_v1 }
   0xa   :  { %157 = vmatpush.bf16.msra.mxu0 %v1026_v2  ;;  %1059 = vmatpush.bf16.msra.mxu1 %v1026_v2 }
   0xb   :  { %1060 = vmatpush.bf16.msra.mxu2 %v1026_v2  ;;  %1061 = vmatpush.bf16.msra.mxu3 %v1026_v2 }
   0xe   :  { %158 = vmatpush.bf16.msra.mxu0 %v1025_v3  ;;  %1062 = vmatpush.bf16.msra.mxu1 %v1025_v3 }
   0xf   :  { %1063 = vmatpush.bf16.msra.mxu2 %v1025_v3  ;;  %1064 = vmatpush.bf16.msra.mxu3 %v1025_v3 }
  0x12   :  { %159 = vmatpush.bf16.msra.mxu0 %v1024_v4  ;;  %1065 = vmatpush.bf16.msra.mxu1 %v1024_v4 }
  0x13   :  { %1066 = vmatpush.bf16.msra.mxu2 %v1024_v4  ;;  %1067 = vmatpush.bf16.msra.mxu3 %v1024_v4 }
  0x16   :  { %160 = vmatpush.bf16.msra.mxu0 %v1023_v5  ;;  %1068 = vmatpush.bf16.msra.mxu1 %v1023_v5 }
  0x17   :  { %1069 = vmatpush.bf16.msra.mxu2 %v1023_v5  ;;  %1070 = vmatpush.bf16.msra.mxu3 %v1023_v5 }
  0x1a   :  { %161 = vmatpush.bf16.msra.mxu0 %v1022_v6  ;;  %1071 = vmatpush.bf16.msra.mxu1 %v1022_v6 }
  0x1b   :  { %1072 = vmatpush.bf16.msra.mxu2 %v1022_v6  ;;  %1073 = vmatpush.bf16.msra.mxu3 %v1022_v6 }
  0x1e   :  { %162 = vmatpush.bf16.msra.mxu0 %v1021_v7  ;;  %1074 = vmatpush.bf16.msra.mxu1 %v1021_v7 }
  0x1f   :  { %1075 = vmatpush.bf16.msra.mxu2 %v1021_v7  ;;  %1076 = vmatpush.bf16.msra.mxu3 %v1021_v7 }
  0x21   :  { %163 = vmatmul.bf16.vlgmr.msra.gmra.mxu0 %v1013_v8  ;;  %173 = vmatmul.bf16.vlgmr.msra.gmra.mxu1 %v1015_v9 }
  0x22   :  { %183 = vmatmul.bf16.vlgmr.msra.gmra.mxu2 %v1017_v10  ;;  %193 = vmatmul.bf16.vlgmr.msra.gmra.mxu3 %v1019_v11 }
  0x31   :  { %168 = vmatmul.bf16.gmra.mxu0 %v1014_v12  ;;  %178 = vmatmul.bf16.gmra.mxu1 %v1016_v13 }
  0x32   :  { %188 = vmatmul.bf16.gmra.mxu2 %v1018_v14  ;;  %198 = vmatmul.bf16.gmra.mxu3 %v1020_v15 }
  0x9e   :  { %v164_v17 = vpop.f32.mrf.mxu0  ;;  %v174_v18 = vpop.f32.mrf.mxu1 }
  0x9f   :  { %v165_v19 = vadd.f32 %v1269_v16, %v164_v17  ;;  %v175_v20 = vadd.f32 %v1269_v16, %v174_v18 }
  0xa1   :  { %204 = vst [vmem:[#allocation2 + $0x30] sm:$0xff] %v165_v19  ;;  %v220_v21 = vmul.f32 0.1, %v165_v19  ;;  %v224_v22 = vmul.f32 0.1, %v175_v20 }
  0xa2   :  { %208 = vst [vmem:[#allocation2 + $0x50] sm:$0xff] %v175_v20 }
  0xa3   :  { %236 = vst [vmem:[#allocation3 + $0x28] sm:$0xff] %v220_v21 }
  0xa4   :  { %240 = vst [vmem:[#allocation3 + $0x48] sm:$0xff] %v224_v22 }
  0xa5   :  { %v184_v23 = vpop.f32.mrf.mxu2  ;;  %v194_v24 = vpop.f32.mrf.mxu3 }
  0xa6   :  { %v185_v25 = vadd.f32 %v1269_v16, %v184_v23  ;;  %v195_v26 = vadd.f32 %v1269_v16, %v194_v24  ;;  %v166_v27 = vpop.f32.mrf.mxu0  ;;  %v176_v28 = vpop.f32.mrf.mxu1 }
  0xa7   :  { %v167_v29 = vadd.f32 %v1269_v16, %v166_v27  ;;  %v177_v30 = vadd.f32 %v1269_v16, %v176_v28 }
  0xa8   :  { %212 = vst [vmem:[#allocation2 + $0x40] sm:$0xff] %v185_v25  ;;  %v228_v31 = vmul.f32 0.1, %v185_v25  ;;  %v232_v32 = vmul.f32 0.1, %v195_v26 }
  0xa9   :  { %216 = vst [vmem:[#allocation2 + $0x60] sm:$0xff] %v195_v26  ;;  %v221_v33 = vmul.f32 0.1, %v167_v29  ;;  %v225_v34 = vmul.f32 0.1, %v177_v30 }
  0xaa   :  { %244 = vst [vmem:[#allocation3 + $0x20] sm:$0xff] %v228_v31 }
  0xab   :  { %248 = vst [vmem:[#allocation3] sm:$0xff] %v232_v32 }
  0xac   :  { %205 = vst [vmem:[#allocation2] sm:$0xff] %v167_v29 }
  0xad   :  { %237 = vst [vmem:[#allocation3 + $0x68] sm:$0xff] %v221_v33  ;;  %v186_v35 = vpop.f32.mrf.mxu2  ;;  %v196_v36 = vpop.f32.mrf.mxu3 }
  0xae   :  { %209 = vst [vmem:[#allocation2 + $0x68] sm:$0xff] %v177_v30  ;;  %v187_v37 = vadd.f32 %v1269_v16, %v186_v35  ;;  %v197_v38 = vadd.f32 %v1269_v16, %v196_v36  ;;  %v169_v39 = vpop.f32.mrf.mxu0  ;;  %v179_v40 = vpop.f32.mrf.mxu1 }
  0xaf   :  { %241 = vst [vmem:[#allocation3 + $0x30] sm:$0xff] %v225_v34  ;;  %v170_v41 = vadd.f32 %v1269_v16, %v169_v39  ;;  %v180_v42 = vadd.f32 %v1269_v16, %v179_v40 }
  0xb0   :  { %213 = vst [vmem:[#allocation2 + $0x20] sm:$0xff] %v187_v37  ;;  %v229_v43 = vmul.f32 0.1, %v187_v37  ;;  %v233_v44 = vmul.f32 0.1, %v197_v38 }
  0xb1   :  { %217 = vst [vmem:[#allocation2 + $0x70] sm:$0xff] %v197_v38  ;;  %v222_v45 = vmul.f32 0.1, %v170_v41  ;;  %v226_v46 = vmul.f32 0.1, %v180_v42 }
  0xb2   :  { %245 = vst [vmem:[#allocation3 + $0x78] sm:$0xff] %v229_v43 }
  0xb3   :  { %249 = vst [vmem:[#allocation3 + $0x8] sm:$0xff] %v233_v44 }
  0xb4   :  { %206 = vst [vmem:[#allocation2 + $0x58] sm:$0xff] %v170_v41 }
  0xb5   :  { %238 = vst [vmem:[#allocation3 + $0x10] sm:$0xff] %v222_v45  ;;  %v189_v47 = vpop.f32.mrf.mxu2  ;;  %v199_v48 = vpop.f32.mrf.mxu3 }
  0xb6   :  { %210 = vst [vmem:[#allocation2 + $0x8] sm:$0xff] %v180_v42  ;;  %v190_v49 = vadd.f32 %v1269_v16, %v189_v47  ;;  %v200_v50 = vadd.f32 %v1269_v16, %v199_v48  ;;  %v171_v51 = vpop.f32.mrf.mxu0  ;;  %v181_v52 = vpop.f32.mrf.mxu1 }
  0xb7   :  { %242 = vst [vmem:[#allocation3 + $0x70] sm:$0xff] %v226_v46  ;;  %v172_v53 = vadd.f32 %v1269_v16, %v171_v51  ;;  %v182_v54 = vadd.f32 %v1269_v16, %v181_v52 }
  0xb8   :  { %214 = vst [vmem:[#allocation2 + $0x10] sm:$0xff] %v190_v49  ;;  %v230_v55 = vmul.f32 0.1, %v190_v49  ;;  %v234_v56 = vmul.f32 0.1, %v200_v50 }
  0xb9   :  { %218 = vst [vmem:[#allocation2 + $0x78] sm:$0xff] %v200_v50  ;;  %v223_v57 = vmul.f32 0.1, %v172_v53  ;;  %v227_v58 = vmul.f32 0.1, %v182_v54 }
  0xba   :  { %246 = vst [vmem:[#allocation3 + $0x18] sm:$0xff] %v230_v55 }
  0xbb   :  { %250 = vst [vmem:[#allocation3 + $0x60] sm:$0xff] %v234_v56 }
  0xbc   :  { %207 = vst [vmem:[#allocation2 + $0x18] sm:$0xff] %v172_v53 }
  0xbd   :  { %239 = vst [vmem:[#allocation3 + $0x40] sm:$0xff] %v223_v57  ;;  %v191_v59 = vpop.f32.mrf.mxu2  ;;  %v201_v60 = vpop.f32.mrf.mxu3 }
  0xbe   :  { %211 = vst [vmem:[#allocation2 + $0x48] sm:$0xff] %v182_v54  ;;  %v192_v61 = vadd.f32 %v1269_v16, %v191_v59  ;;  %v202_v62 = vadd.f32 %v1269_v16, %v201_v60 }
  0xbf   :  { %243 = vst [vmem:[#allocation3 + $0x38] sm:$0xff] %v227_v58 }
  0xc0   :  { %215 = vst [vmem:[#allocation2 + $0x38] sm:$0xff] %v192_v61  ;;  %v231_v63 = vmul.f32 0.1, %v192_v61  ;;  %v235_v0 = vmul.f32 0.1, %v202_v62 }
  0xc1   :  { %219 = vst [vmem:[#allocation2 + $0x28] sm:$0xff] %v202_v62 }
  0xc2   :  { %247 = vst [vmem:[#allocation3 + $0x58] sm:$0xff] %v231_v63 }
  0xc3   :  { %251 = vst [vmem:[#allocation3 + $0x50] sm:$0xff] %v235_v0 }
  0xc4 LB: > { %v288_v1 = vld [vmem:[#allocation2 + $0x78] sm:$0xff]  ;;  %v286_v3 = vld [vmem:[#allocation2 + $0x60] sm:$0xff]  ;;  %v287_v5 = vld [vmem:[#allocation2 + $0x70] sm:$0xff]  ;;  %s257_s0 = sadd.s32 1, %s1177_s0   ;;  %s1177_s0 = sphi %s1287_s0, %s257_s0  }
  0xc5   : > { %v296_v6 = vpack.c.bf16 %v287_v5, %v286_v3  ;;  %v284_v7 = vld [vmem:[#allocation2 + $0x10] sm:$0xff]  ;;  %v282_v10 = vld [vmem:[#allocation2 + $0x40] sm:$0xff]  ;;  %v280_v13 = vld [vmem:[#allocation2 + $0x8] sm:$0xff]  ;;  %p254_p0 = scmp.ge.s32.totalorder %s257_s0, 10  }
  0xc6   : > { %v283_v11 = vld [vmem:[#allocation2 + $0x20] sm:$0xff]  ;;  %v281_v14 = vld [vmem:[#allocation2 + $0x48] sm:$0xff]  ;;  %v278_v16 = vld [vmem:[#allocation2 + $0x50] sm:$0xff] }
  0xc7   : > { %v285_v8 = vld [vmem:[#allocation2 + $0x38] sm:$0xff]  ;;  %v294_v12 = vpack.c.bf16 %v283_v11, %v282_v10  ;;  %v293_v15 = vpack.c.bf16 %v281_v14, %v280_v13  ;;  %v279_v17 = vld [vmem:[#allocation2 + $0x68] sm:$0xff]  ;;  %v274_v22 = vld [vmem:[#allocation2 + $0x30] sm:$0xff] }
  0xc8   : > { %v289_v2 = vld [vmem:[#allocation2 + $0x28] sm:$0xff]  ;;  %v295_v9 = vpack.c.bf16 %v285_v8, %v284_v7  ;;  %v292_v18 = vpack.c.bf16 %v279_v17, %v278_v16  ;;  %v276_v19 = vld [vmem:[#allocation2 + $0x58] sm:$0xff]  ;;  %v275_v23 = vld [vmem:[#allocation2] sm:$0xff] }
  0xc9   : > { %v297_v4 = vpack.c.bf16 %v289_v2, %v288_v1  ;;  %v277_v20 = vld [vmem:[#allocation2 + $0x18] sm:$0xff]  ;;  %v290_v24 = vpack.c.bf16 %v275_v23, %v274_v22  ;;  %v1029_v25 = vld [vmem:[%s1447_s5] sm:$0xff]  ;;  %v1031_v26 = vld [vmem:[%s1447_s5 + $0x10] sm:$0xff] }
  0xca   : > { %v291_v21 = vpack.c.bf16 %v277_v20, %v276_v19  ;;  %v1033_v27 = vld [vmem:[%s1447_s5 + $0x20] sm:$0xff]  ;;  %v1035_v28 = vld [vmem:[%s1447_s5 + $0x30] sm:$0xff]  ;;  %v1030_v29 = vld [vmem:[%s1447_s5 + $0x8] sm:$0xff] }
  0xcb   : > { %362 = vmatpush.bf16.msra.mxu0 %v297_v4  ;;  %1077 = vmatpush.bf16.msra.mxu1 %v297_v4  ;;  %v1032_v30 = vld [vmem:[%s1447_s5 + $0x18] sm:$0xff]  ;;  %v1034_v31 = vld [vmem:[%s1447_s5 + $0x28] sm:$0xff]  ;;  %v306_v39 = vld [vmem:[#allocation3 + $0x20] sm:$0xff] }
  0xcc   : > { %1078 = vmatpush.bf16.msra.mxu2 %v297_v4  ;;  %1079 = vmatpush.bf16.msra.mxu3 %v297_v4  ;;  %v1036_v32 = vld [vmem:[%s1447_s5 + $0x38] sm:$0xff]  ;;  %v298_v33 = vld [vmem:[#allocation3 + $0x28] sm:$0xff]  ;;  %v310_v40 = vld [vmem:[#allocation3] sm:$0xff] }
  0xcd   : > { %v302_v34 = vld [vmem:[#allocation3 + $0x48] sm:$0xff]  ;;  %v303_v42 = vld [vmem:[#allocation3 + $0x30] sm:$0xff]  ;;  %v307_v51 = vld [vmem:[#allocation3 + $0x78] sm:$0xff] }
  0xce   : > { %v299_v41 = vld [vmem:[#allocation3 + $0x68] sm:$0xff]  ;;  %v300_v53 = vld [vmem:[#allocation3 + $0x10] sm:$0xff]  ;;  %v308_v63 = vld [vmem:[#allocation3 + $0x18] sm:$0xff] }
  0xcf   : > { %363 = vmatpush.bf16.msra.mxu0 %v296_v6  ;;  %1080 = vmatpush.bf16.msra.mxu1 %v296_v6  ;;  %v311_v52 = vld [vmem:[#allocation3 + $0x8] sm:$0xff]  ;;  %v304_v54 = vld [vmem:[#allocation3 + $0x70] sm:$0xff]  ;;  %v312_v0 = vld [vmem:[#allocation3 + $0x60] sm:$0xff] }
  0xd0   : > { %1081 = vmatpush.bf16.msra.mxu2 %v296_v6  ;;  %1082 = vmatpush.bf16.msra.mxu3 %v296_v6  ;;  %v301_v1 = vld [vmem:[#allocation3 + $0x40] sm:$0xff]  ;;  %v305_v2 = vld [vmem:[#allocation3 + $0x38] sm:$0xff]  ;;  %v1042_v19 = vld [vmem:[%s1445_s3 + $0x28] sm:$0xff] (%p254_p0) }
  0xd1   : > { %v309_v11 = vld [vmem:[#allocation3 + $0x58] sm:$0xff]  ;;  %v1041_v20 = vld [vmem:[%s1445_s3 + $0x20] sm:$0xff] (%p254_p0)  ;;  %v1039_v22 = vld [vmem:[%s1445_s3 + $0x10] sm:$0xff] (%p254_p0) }
  0xd2   :  { %v1044_v17 = vld [vmem:[%s1445_s3 + $0x38] sm:$0xff] (%p254_p0)  ;;  %v1038_v23 = vld [vmem:[%s1445_s3 + $0x8] sm:$0xff] (%p254_p0) }
  0xd3   : > { %364 = vmatpush.bf16.msra.mxu0 %v295_v9  ;;  %1083 = vmatpush.bf16.msra.mxu1 %v295_v9 }
  0xd4   : > { %1084 = vmatpush.bf16.msra.mxu2 %v295_v9  ;;  %1085 = vmatpush.bf16.msra.mxu3 %v295_v9 }
  0xd7   : > { %365 = vmatpush.bf16.msra.mxu0 %v294_v12  ;;  %1086 = vmatpush.bf16.msra.mxu1 %v294_v12 }
  0xd8   : > { %1087 = vmatpush.bf16.msra.mxu2 %v294_v12  ;;  %1088 = vmatpush.bf16.msra.mxu3 %v294_v12  ;;  %v313_v12 = vld [vmem:[#allocation3 + $0x50] sm:$0xff] }
  0xdb   : > { %366 = vmatpush.bf16.msra.mxu0 %v293_v15  ;;  %1089 = vmatpush.bf16.msra.mxu1 %v293_v15 }
  0xdc   : > { %1090 = vmatpush.bf16.msra.mxu2 %v293_v15  ;;  %1091 = vmatpush.bf16.msra.mxu3 %v293_v15 }
  0xdf   : > { %367 = vmatpush.bf16.msra.mxu0 %v292_v18  ;;  %1092 = vmatpush.bf16.msra.mxu1 %v292_v18 }
  0xe0   : > { %1093 = vmatpush.bf16.msra.mxu2 %v292_v18  ;;  %1094 = vmatpush.bf16.msra.mxu3 %v292_v18  ;;  %v1043_v18 = vld [vmem:[%s1445_s3 + $0x30] sm:$0xff] (%p254_p0) }
  0xe3   : > { %368 = vmatpush.bf16.msra.mxu0 %v291_v21  ;;  %1095 = vmatpush.bf16.msra.mxu1 %v291_v21 }
  0xe4   : > { %1096 = vmatpush.bf16.msra.mxu2 %v291_v21  ;;  %1097 = vmatpush.bf16.msra.mxu3 %v291_v21  ;;  %v1040_v21 = vld [vmem:[%s1445_s3 + $0x18] sm:$0xff] (%p254_p0) }
  0xe7   : > { %369 = vmatpush.bf16.msra.mxu0 %v290_v24  ;;  %1098 = vmatpush.bf16.msra.mxu1 %v290_v24 }
  0xe8   : > { %1099 = vmatpush.bf16.msra.mxu2 %v290_v24  ;;  %1100 = vmatpush.bf16.msra.mxu3 %v290_v24 }
  0xea   : > { %370 = vmatmul.bf16.vlgmr.msra.gmra.mxu0 %v1029_v25  ;;  %380 = vmatmul.bf16.vlgmr.msra.gmra.mxu1 %v1031_v26 }
  0xeb   : > { %390 = vmatmul.bf16.vlgmr.msra.gmra.mxu2 %v1033_v27  ;;  %400 = vmatmul.bf16.vlgmr.msra.gmra.mxu3 %v1035_v28 }
  0xec   :  { %535 = vmatpush.bf16.msra.mxu0 (%p254_p0), %v1044_v17  ;;  %1101 = vmatpush.bf16.msra.mxu1 (%p254_p0), %v1044_v17 }
  0xed   :  { %1102 = vmatpush.bf16.msra.mxu2 (%p254_p0), %v1044_v17  ;;  %1103 = vmatpush.bf16.msra.mxu3 (%p254_p0), %v1044_v17 }
  0xf0   :  { %536 = vmatpush.bf16.msra.mxu0 (%p254_p0), %v1043_v18  ;;  %1104 = vmatpush.bf16.msra.mxu1 (%p254_p0), %v1043_v18 }
  0xf1   :  { %1105 = vmatpush.bf16.msra.mxu2 (%p254_p0), %v1043_v18  ;;  %1106 = vmatpush.bf16.msra.mxu3 (%p254_p0), %v1043_v18 }
  0xf4   :  { %537 = vmatpush.bf16.msra.mxu0 (%p254_p0), %v1042_v19  ;;  %1107 = vmatpush.bf16.msra.mxu1 (%p254_p0), %v1042_v19 }
  0xf5   :  { %1108 = vmatpush.bf16.msra.mxu2 (%p254_p0), %v1042_v19  ;;  %1109 = vmatpush.bf16.msra.mxu3 (%p254_p0), %v1042_v19 }
  0xf8   :  { %538 = vmatpush.bf16.msra.mxu0 (%p254_p0), %v1041_v20  ;;  %1110 = vmatpush.bf16.msra.mxu1 (%p254_p0), %v1041_v20 }
  0xf9   :  { %1111 = vmatpush.bf16.msra.mxu2 (%p254_p0), %v1041_v20  ;;  %1112 = vmatpush.bf16.msra.mxu3 (%p254_p0), %v1041_v20 }
  0xfa   : > { %375 = vmatmul.bf16.gmra.mxu0 %v1030_v29  ;;  %385 = vmatmul.bf16.gmra.mxu1 %v1032_v30 }
  0xfb   : > { %395 = vmatmul.bf16.gmra.mxu2 %v1034_v31  ;;  %405 = vmatmul.bf16.gmra.mxu3 %v1036_v32 }
  0xfc   :  { %539 = vmatpush.bf16.msra.mxu0 (%p254_p0), %v1040_v21  ;;  %1113 = vmatpush.bf16.msra.mxu1 (%p254_p0), %v1040_v21 }
  0xfd   :  { %1114 = vmatpush.bf16.msra.mxu2 (%p254_p0), %v1040_v21  ;;  %1115 = vmatpush.bf16.msra.mxu3 (%p254_p0), %v1040_v21 }
 0x100   :  { %540 = vmatpush.bf16.msra.mxu0 (%p254_p0), %v1039_v22  ;;  %1116 = vmatpush.bf16.msra.mxu1 (%p254_p0), %v1039_v22 }
 0x101   :  { %1117 = vmatpush.bf16.msra.mxu2 (%p254_p0), %v1039_v22  ;;  %1118 = vmatpush.bf16.msra.mxu3 (%p254_p0), %v1039_v22 }
 0x104   :  { %541 = vmatpush.bf16.msra.mxu0 (%p254_p0), %v1038_v23  ;;  %1119 = vmatpush.bf16.msra.mxu1 (%p254_p0), %v1038_v23 }
 0x105   :  { %1120 = vmatpush.bf16.msra.mxu2 (%p254_p0), %v1038_v23  ;;  %1121 = vmatpush.bf16.msra.mxu3 (%p254_p0), %v1038_v23 }
 0x167   : > { %v371_v35 = vpop.f32.mrf.mxu0  ;;  %v381_v36 = vpop.f32.mrf.mxu1 }
 0x168   : > { %v372_v37 = vadd.f32 %v371_v35, %v298_v33  ;;  %v382_v38 = vadd.f32 %v381_v36, %v302_v34  ;;  %v1037_v36 = vld [vmem:[%s1445_s3] sm:$0xff] (%p254_p0) }
 0x169   :  { %542 = vmatpush.bf16.msra.mxu0 (%p254_p0), %v1037_v36  ;;  %1122 = vmatpush.bf16.msra.mxu1 (%p254_p0), %v1037_v36 }
 0x16a   : > { %411 = vst [vmem:[#allocation2 + $0x30] sm:$0xff] %v372_v37  ;;  %1123 = vmatpush.bf16.msra.mxu2 (%p254_p0), %v1037_v36  ;;  %1124 = vmatpush.bf16.msra.mxu3 (%p254_p0), %v1037_v36 }
 0x16b   : > { %415 = vst [vmem:[#allocation2 + $0x50] sm:$0xff] %v382_v38 }
 0x16e   : > { %v391_v43 = vpop.f32.mrf.mxu2  ;;  %v401_v44 = vpop.f32.mrf.mxu3 }
 0x16f   : > { %v392_v45 = vadd.f32 %v391_v43, %v306_v39  ;;  %v402_v46 = vadd.f32 %v401_v44, %v310_v40  ;;  %v373_v47 = vpop.f32.mrf.mxu0  ;;  %v383_v48 = vpop.f32.mrf.mxu1 }
 0x170   : > { %v374_v49 = vadd.f32 %v373_v47, %v299_v41  ;;  %v384_v50 = vadd.f32 %v383_v48, %v303_v42 }
 0x171   : > { %419 = vst [vmem:[#allocation2 + $0x40] sm:$0xff] %v392_v45  ;;  %v427_v24 = vld [vmem:[#allocation2 + $0x30] sm:$0xff] (%p254_p0) }
 0x172   : > { %423 = vst [vmem:[#allocation2 + $0x60] sm:$0xff] %v402_v46  ;;  %v431_v26 = vld [vmem:[#allocation2 + $0x50] sm:$0xff] (%p254_p0)  ;;  %v443_v32 = vmax.f32 (%p254_p0), %v427_v24, 0.0 }
 0x173   : > { %412 = vst [vmem:[#allocation2] sm:$0xff] %v374_v49  ;;  %v447_v34 = vmax.f32 (%p254_p0), %v431_v26, 0.0 }
 0x174   : > { %416 = vst [vmem:[#allocation2 + $0x68] sm:$0xff] %v384_v50 }
 0x176   : > { %v393_v55 = vpop.f32.mrf.mxu2  ;;  %v403_v56 = vpop.f32.mrf.mxu3 }
 0x177   : > { %v394_v57 = vadd.f32 %v393_v55, %v307_v51  ;;  %v404_v58 = vadd.f32 %v403_v56, %v311_v52  ;;  %v376_v59 = vpop.f32.mrf.mxu0  ;;  %v386_v60 = vpop.f32.mrf.mxu1 }
 0x178   : > { %v377_v61 = vadd.f32 %v376_v59, %v300_v53  ;;  %v387_v62 = vadd.f32 %v386_v60, %v304_v54  ;;  %v435_v28 = vld [vmem:[#allocation2 + $0x40] sm:$0xff] (%p254_p0) }
 0x179   : > { %420 = vst [vmem:[#allocation2 + $0x20] sm:$0xff] %v394_v57  ;;  %v439_v30 = vld [vmem:[#allocation2 + $0x60] sm:$0xff] (%p254_p0)  ;;  %v451_v37 = vmax.f32 (%p254_p0), %v435_v28, 0.0 }
 0x17a   : > { %424 = vst [vmem:[#allocation2 + $0x70] sm:$0xff] %v404_v58  ;;  %v428_v25 = vld [vmem:[#allocation2] sm:$0xff] (%p254_p0)  ;;  %v455_v39 = vmax.f32 (%p254_p0), %v439_v30, 0.0 }
 0x17b   : > { %413 = vst [vmem:[#allocation2 + $0x58] sm:$0xff] %v377_v61  ;;  %v432_v27 = vld [vmem:[#allocation2 + $0x68] sm:$0xff] (%p254_p0)  ;;  %v444_v33 = vmax.f32 (%p254_p0), %v428_v25, 0.0 }
 0x17c   : > { %417 = vst [vmem:[#allocation2 + $0x8] sm:$0xff] %v387_v62  ;;  %v448_v35 = vmax.f32 (%p254_p0), %v432_v27, 0.0 }
 0x17d   :  { %v459_v41 = vpack.c.bf16 (%p254_p0), %v444_v33, %v443_v32 }
 0x17e   : > { %v396_v3 = vpop.f32.mrf.mxu2  ;;  %v406_v4 = vpop.f32.mrf.mxu3  ;;  %v461_v42 = vpack.c.bf16 (%p254_p0), %v448_v35, %v447_v34 }
 0x17f   : > { %v397_v5 = vadd.f32 %v396_v3, %v308_v63  ;;  %v407_v6 = vadd.f32 %v406_v4, %v312_v0  ;;  %v378_v7 = vpop.f32.mrf.mxu0  ;;  %v388_v8 = vpop.f32.mrf.mxu1  ;;  %543 = vmatmul.bf16.vlgmr.msra.gmra.mxu0 (%p254_p0), %v459_v41 }
 0x180   : > { %v379_v9 = vadd.f32 %v378_v7, %v301_v1  ;;  %v389_v10 = vadd.f32 %v388_v8, %v305_v2  ;;  %v436_v29 = vld [vmem:[#allocation2 + $0x20] sm:$0xff] (%p254_p0)  ;;  %553 = vmatmul.bf16.vlgmr.msra.gmra.mxu1 (%p254_p0), %v461_v42 }
 0x181   : > { %421 = vst [vmem:[#allocation2 + $0x10] sm:$0xff] %v397_v5  ;;  %v440_v31 = vld [vmem:[#allocation2 + $0x70] sm:$0xff] (%p254_p0)  ;;  %v452_v38 = vmax.f32 (%p254_p0), %v436_v29, 0.0  ;;  %v1346_v1 = vld [vmem:[%s1446_s4] ss:$0 sm:$0xff] (%p254_p0)  ;;  %s1364_s4 = smov (%p254_p0), 0  }
 0x182   : > { %425 = vst [vmem:[#allocation2 + $0x78] sm:$0xff] %v407_v6  ;;  %v456_v40 = vmax.f32 (%p254_p0), %v440_v31, 0.0  ;;  %v429_v45 = vld [vmem:[#allocation2 + $0x58] sm:$0xff] (%p254_p0) }
 0x183   : > { %414 = vst [vmem:[#allocation2 + $0x18] sm:$0xff] %v379_v9  ;;  %v463_v43 = vpack.c.bf16 (%p254_p0), %v452_v38, %v451_v37  ;;  %v433_v47 = vld [vmem:[#allocation2 + $0x8] sm:$0xff] (%p254_p0)  ;;  %v445_v53 = vmax.f32 (%p254_p0), %v429_v45, 0.0 }
 0x184   : > { %418 = vst [vmem:[#allocation2 + $0x48] sm:$0xff] %v389_v10  ;;  %v465_v44 = vpack.c.bf16 (%p254_p0), %v456_v40, %v455_v39  ;;  %v449_v55 = vmax.f32 (%p254_p0), %v433_v47, 0.0 }
 0x185   :  { %563 = vmatmul.bf16.vlgmr.msra.gmra.mxu2 (%p254_p0), %v463_v43 }
 0x186   : > { %v398_v13 = vpop.f32.mrf.mxu2  ;;  %v408_v14 = vpop.f32.mrf.mxu3  ;;  %573 = vmatmul.bf16.vlgmr.msra.gmra.mxu3 (%p254_p0), %v465_v44 }
 0x187   : > { %v399_v15 = vadd.f32 %v398_v13, %v309_v11  ;;  %v409_v16 = vadd.f32 %v408_v14, %v313_v12  ;;  %256 = sbr.rel (!%p254_p0) target bundleno = 196 (0xc4), region = 58 }
 0x188   :  { %v437_v49 = vld [vmem:[#allocation2 + $0x10] sm:$0xff] (%p254_p0) }
 0x189   : > { %422 = vst [vmem:[#allocation2 + $0x38] sm:$0xff] %v399_v15  ;;  %v441_v51 = vld [vmem:[#allocation2 + $0x78] sm:$0xff] (%p254_p0)  ;;  %v453_v57 = vmax.f32 (%p254_p0), %v437_v49, 0.0 }
 0x18a   : > { %426 = vst [vmem:[#allocation2 + $0x28] sm:$0xff] %v409_v16  ;;  %v430_v46 = vld [vmem:[#allocation2 + $0x18] sm:$0xff] (%p254_p0)  ;;  %v457_v59 = vmax.f32 (%p254_p0), %v441_v51, 0.0 }
 0x18b   :  { %v434_v48 = vld [vmem:[#allocation2 + $0x48] sm:$0xff] (%p254_p0)  ;;  %v446_v54 = vmax.f32 (%p254_p0), %v430_v46, 0.0 }
 0x18c   :  { %v450_v56 = vmax.f32 %v434_v48, 0.0 }
 0x18d   :  { %v460_v61 = vpack.c.bf16 %v446_v54, %v445_v53 }
 0x18e   :  { %v462_v62 = vpack.c.bf16 %v450_v56, %v449_v55 }
 0x18f   :  { %548 = vmatmul.bf16.gmra.mxu0 %v460_v61 }
 0x190   :  { %v438_v50 = vld [vmem:[#allocation2 + $0x38] sm:$0xff]  ;;  %558 = vmatmul.bf16.gmra.mxu1 %v462_v62 }
 0x191   :  { %v442_v52 = vld [vmem:[#allocation2 + $0x28] sm:$0xff]  ;;  %v454_v58 = vmax.f32 %v438_v50, 0.0 }
 0x192   :  { %v458_v60 = vmax.f32 %v442_v52, 0.0 }
 0x193   :  { %v464_v63 = vpack.c.bf16 %v454_v58, %v453_v57 }
 0x194   :  { %v466_v0 = vpack.c.bf16 %v458_v60, %v457_v59 }
 0x195   :  { %568 = vmatmul.bf16.gmra.mxu2 %v464_v63 }
 0x196   :  { %578 = vmatmul.bf16.gmra.mxu3 %v466_v0 }
 0x1fc   :  { %v544_v2 = vpop.f32.mrf.mxu0 }
 0x1fd   :  { %v554_v3 = vpop.f32.mrf.mxu1  ;;  %v545_v4 = vadd.f32 %v1346_v1, %v544_v2 }
 0x1fe   :  { %v555_v5 = vadd.f32 %v1346_v1, %v554_v3 }
 0x1ff   :  { %584 = vst [vmem:[#allocation2 + $0x30] sm:$0xff] %v545_v4  ;;  %v600_v6 = vmul.f32 0.1, %v545_v4 }
 0x200   :  { %v604_v7 = vmul.f32 0.1, %v555_v5  ;;  %588 = vst [vmem:[#allocation2 + $0x50] sm:$0xff] %v555_v5 }
 0x201   :  { %616 = vst [vmem:[#allocation3 + $0x28] sm:$0xff] %v600_v6 }
 0x202   :  { %620 = vst [vmem:[#allocation3 + $0x48] sm:$0xff] %v604_v7 }
 0x204   :  { %v546_v12 = vpop.f32.mrf.mxu0 }
 0x205   :  { %v556_v13 = vpop.f32.mrf.mxu1  ;;  %v547_v14 = vadd.f32 %v1346_v1, %v546_v12 }
 0x206   :  { %v557_v15 = vadd.f32 %v1346_v1, %v556_v13 }
 0x207   :  { %v601_v18 = vmul.f32 0.1, %v547_v14  ;;  %585 = vst [vmem:[#allocation2] sm:$0xff] %v547_v14 }
 0x208   :  { %v564_v8 = vpop.f32.mrf.mxu2  ;;  %v605_v19 = vmul.f32 0.1, %v557_v15  ;;  %589 = vst [vmem:[#allocation2 + $0x68] sm:$0xff] %v557_v15 }
 0x209   :  { %v574_v9 = vpop.f32.mrf.mxu3  ;;  %v565_v10 = vadd.f32 %v1346_v1, %v564_v8  ;;  %617 = vst [vmem:[#allocation3 + $0x68] sm:$0xff] %v601_v18 }
 0x20a   :  { %v575_v11 = vadd.f32 %v1346_v1, %v574_v9  ;;  %621 = vst [vmem:[#allocation3 + $0x30] sm:$0xff] %v605_v19 }
 0x20b   :  { %592 = vst [vmem:[#allocation2 + $0x40] sm:$0xff] %v565_v10  ;;  %v608_v16 = vmul.f32 0.1, %v565_v10 }
 0x20c   :  { %v612_v17 = vmul.f32 0.1, %v575_v11  ;;  %596 = vst [vmem:[#allocation2 + $0x60] sm:$0xff] %v575_v11  ;;  %v549_v24 = vpop.f32.mrf.mxu0 }
 0x20d   :  { %624 = vst [vmem:[#allocation3 + $0x20] sm:$0xff] %v608_v16  ;;  %v559_v25 = vpop.f32.mrf.mxu1  ;;  %v550_v26 = vadd.f32 %v1346_v1, %v549_v24 }
 0x20e   :  { %628 = vst [vmem:[#allocation3] sm:$0xff] %v612_v17  ;;  %v560_v27 = vadd.f32 %v1346_v1, %v559_v25 }
 0x20f   :  { %v602_v30 = vmul.f32 0.1, %v550_v26  ;;  %586 = vst [vmem:[#allocation2 + $0x58] sm:$0xff] %v550_v26 }
 0x210   :  { %v566_v20 = vpop.f32.mrf.mxu2  ;;  %v606_v31 = vmul.f32 0.1, %v560_v27  ;;  %590 = vst [vmem:[#allocation2 + $0x8] sm:$0xff] %v560_v27 }
 0x211   :  { %v576_v21 = vpop.f32.mrf.mxu3  ;;  %v567_v22 = vadd.f32 %v1346_v1, %v566_v20  ;;  %618 = vst [vmem:[#allocation3 + $0x10] sm:$0xff] %v602_v30 }
 0x212   :  { %v577_v23 = vadd.f32 %v1346_v1, %v576_v21  ;;  %622 = vst [vmem:[#allocation3 + $0x70] sm:$0xff] %v606_v31 }
 0x213   :  { %593 = vst [vmem:[#allocation2 + $0x20] sm:$0xff] %v567_v22  ;;  %v609_v28 = vmul.f32 0.1, %v567_v22 }
 0x214   :  { %v613_v29 = vmul.f32 0.1, %v577_v23  ;;  %597 = vst [vmem:[#allocation2 + $0x70] sm:$0xff] %v577_v23  ;;  %v551_v36 = vpop.f32.mrf.mxu0 }
 0x215   :  { %625 = vst [vmem:[#allocation3 + $0x78] sm:$0xff] %v609_v28  ;;  %v561_v37 = vpop.f32.mrf.mxu1  ;;  %v552_v38 = vadd.f32 %v1346_v1, %v551_v36 }
 0x216   :  { %629 = vst [vmem:[#allocation3 + $0x8] sm:$0xff] %v613_v29  ;;  %v562_v39 = vadd.f32 %v1346_v1, %v561_v37 }
 0x217   :  { %v603_v42 = vmul.f32 0.1, %v552_v38  ;;  %587 = vst [vmem:[#allocation2 + $0x18] sm:$0xff] %v552_v38 }
 0x218   :  { %v569_v32 = vpop.f32.mrf.mxu2  ;;  %v607_v43 = vmul.f32 0.1, %v562_v39  ;;  %591 = vst [vmem:[#allocation2 + $0x48] sm:$0xff] %v562_v39 }
 0x219   :  { %v579_v33 = vpop.f32.mrf.mxu3  ;;  %v570_v34 = vadd.f32 %v1346_v1, %v569_v32  ;;  %619 = vst [vmem:[#allocation3 + $0x40] sm:$0xff] %v603_v42 }
 0x21a   :  { %v580_v35 = vadd.f32 %v1346_v1, %v579_v33  ;;  %623 = vst [vmem:[#allocation3 + $0x38] sm:$0xff] %v607_v43 }
 0x21b   :  { %594 = vst [vmem:[#allocation2 + $0x10] sm:$0xff] %v570_v34  ;;  %v610_v40 = vmul.f32 0.1, %v570_v34 }
 0x21c   :  { %v614_v41 = vmul.f32 0.1, %v580_v35  ;;  %598 = vst [vmem:[#allocation2 + $0x78] sm:$0xff] %v580_v35 }
 0x21d   :  { %626 = vst [vmem:[#allocation3 + $0x18] sm:$0xff] %v610_v40 }
 0x21e   :  { %630 = vst [vmem:[#allocation3 + $0x60] sm:$0xff] %v614_v41 }
 0x220   :  { %v571_v44 = vpop.f32.mrf.mxu2 }
 0x221   :  { %v581_v45 = vpop.f32.mrf.mxu3  ;;  %v572_v46 = vadd.f32 %v1346_v1, %v571_v44 }
 0x222   :  { %v582_v47 = vadd.f32 %v1346_v1, %v581_v45 }
 0x223   :  { %595 = vst [vmem:[#allocation2 + $0x38] sm:$0xff] %v572_v46  ;;  %v611_v48 = vmul.f32 0.1, %v572_v46 }
 0x224   :  { %v615_v49 = vmul.f32 0.1, %v582_v47  ;;  %599 = vst [vmem:[#allocation2 + $0x28] sm:$0xff] %v582_v47 }
 0x225   :  { %627 = vst [vmem:[#allocation3 + $0x58] sm:$0xff] %v611_v48 }
 0x226   :  { %631 = vst [vmem:[#allocation3 + $0x50] sm:$0xff] %v615_v49 }
 0x227 LB: > { %v668_v50 = vld [vmem:[#allocation2 + $0x78] sm:$0xff]  ;;  %v666_v52 = vld [vmem:[#allocation2 + $0x60] sm:$0xff]  ;;  %v667_v54 = vld [vmem:[#allocation2 + $0x70] sm:$0xff]  ;;  %s637_s4 = sadd.s32 1, %s1181_s4   ;;  %s1181_s4 = sphi %s1364_s4, %s637_s4  }
 0x228   : > { %v676_v55 = vpack.c.bf16 %v667_v54, %v666_v52  ;;  %v664_v56 = vld [vmem:[#allocation2 + $0x10] sm:$0xff]  ;;  %v662_v59 = vld [vmem:[#allocation2 + $0x40] sm:$0xff]  ;;  %v660_v62 = vld [vmem:[#allocation2 + $0x8] sm:$0xff]  ;;  %p634_p1 = scmp.ge.s32.totalorder %s637_s4, 10  }
 0x229   : > { %v663_v60 = vld [vmem:[#allocation2 + $0x20] sm:$0xff]  ;;  %v661_v63 = vld [vmem:[#allocation2 + $0x48] sm:$0xff]  ;;  %v658_v1 = vld [vmem:[#allocation2 + $0x50] sm:$0xff] }
 0x22a   : > { %v665_v57 = vld [vmem:[#allocation2 + $0x38] sm:$0xff]  ;;  %v674_v61 = vpack.c.bf16 %v663_v60, %v662_v59  ;;  %v673_v0 = vpack.c.bf16 %v661_v63, %v660_v62  ;;  %v659_v2 = vld [vmem:[#allocation2 + $0x68] sm:$0xff]  ;;  %v654_v7 = vld [vmem:[#allocation2 + $0x30] sm:$0xff] }
 0x22b   : > { %v669_v51 = vld [vmem:[#allocation2 + $0x28] sm:$0xff]  ;;  %v675_v58 = vpack.c.bf16 %v665_v57, %v664_v56  ;;  %v672_v3 = vpack.c.bf16 %v659_v2, %v658_v1  ;;  %v656_v4 = vld [vmem:[#allocation2 + $0x58] sm:$0xff]  ;;  %v655_v8 = vld [vmem:[#allocation2] sm:$0xff] }
 0x22c   : > { %v677_v53 = vpack.c.bf16 %v669_v51, %v668_v50  ;;  %v657_v5 = vld [vmem:[#allocation2 + $0x18] sm:$0xff]  ;;  %v670_v9 = vpack.c.bf16 %v655_v8, %v654_v7  ;;  %v1045_v10 = vld [vmem:[%s1447_s5] sm:$0xff]  ;;  %v1047_v11 = vld [vmem:[%s1447_s5 + $0x10] sm:$0xff] }
 0x22d   : > { %v671_v6 = vpack.c.bf16 %v657_v5, %v656_v4  ;;  %v1049_v12 = vld [vmem:[%s1447_s5 + $0x20] sm:$0xff]  ;;  %v1051_v13 = vld [vmem:[%s1447_s5 + $0x30] sm:$0xff]  ;;  %v1046_v14 = vld [vmem:[%s1447_s5 + $0x8] sm:$0xff] }
 0x22e   : > { %742 = vmatpush.bf16.msra.mxu0 %v677_v53  ;;  %1125 = vmatpush.bf16.msra.mxu1 %v677_v53  ;;  %v1048_v15 = vld [vmem:[%s1447_s5 + $0x18] sm:$0xff]  ;;  %v1050_v16 = vld [vmem:[%s1447_s5 + $0x28] sm:$0xff]  ;;  %v686_v24 = vld [vmem:[#allocation3 + $0x20] sm:$0xff] }
 0x22f   : > { %1126 = vmatpush.bf16.msra.mxu2 %v677_v53  ;;  %1127 = vmatpush.bf16.msra.mxu3 %v677_v53  ;;  %v1052_v17 = vld [vmem:[%s1447_s5 + $0x38] sm:$0xff]  ;;  %v678_v18 = vld [vmem:[#allocation3 + $0x28] sm:$0xff]  ;;  %v690_v25 = vld [vmem:[#allocation3] sm:$0xff] }
 0x230   : > { %v682_v19 = vld [vmem:[#allocation3 + $0x48] sm:$0xff]  ;;  %v683_v27 = vld [vmem:[#allocation3 + $0x30] sm:$0xff]  ;;  %v687_v36 = vld [vmem:[#allocation3 + $0x78] sm:$0xff] }
 0x231   : > { %v679_v26 = vld [vmem:[#allocation3 + $0x68] sm:$0xff]  ;;  %v680_v38 = vld [vmem:[#allocation3 + $0x10] sm:$0xff]  ;;  %v688_v48 = vld [vmem:[#allocation3 + $0x18] sm:$0xff] }
 0x232   : > { %743 = vmatpush.bf16.msra.mxu0 %v676_v55  ;;  %1128 = vmatpush.bf16.msra.mxu1 %v676_v55  ;;  %v691_v37 = vld [vmem:[#allocation3 + $0x8] sm:$0xff]  ;;  %v684_v39 = vld [vmem:[#allocation3 + $0x70] sm:$0xff]  ;;  %v692_v49 = vld [vmem:[#allocation3 + $0x60] sm:$0xff] }
 0x233   : > { %1129 = vmatpush.bf16.msra.mxu2 %v676_v55  ;;  %1130 = vmatpush.bf16.msra.mxu3 %v676_v55  ;;  %v681_v50 = vld [vmem:[#allocation3 + $0x40] sm:$0xff]  ;;  %v685_v51 = vld [vmem:[#allocation3 + $0x38] sm:$0xff] }
 0x234   : > { %v689_v60 = vld [vmem:[#allocation3 + $0x58] sm:$0xff] }
 0x236   : > { %744 = vmatpush.bf16.msra.mxu0 %v675_v58  ;;  %1131 = vmatpush.bf16.msra.mxu1 %v675_v58 }
 0x237   : > { %1132 = vmatpush.bf16.msra.mxu2 %v675_v58  ;;  %1133 = vmatpush.bf16.msra.mxu3 %v675_v58 }
 0x23a   : > { %745 = vmatpush.bf16.msra.mxu0 %v674_v61  ;;  %1134 = vmatpush.bf16.msra.mxu1 %v674_v61 }
 0x23b   : > { %1135 = vmatpush.bf16.msra.mxu2 %v674_v61  ;;  %1136 = vmatpush.bf16.msra.mxu3 %v674_v61  ;;  %v693_v61 = vld [vmem:[#allocation3 + $0x50] sm:$0xff] }
 0x23e   : > { %746 = vmatpush.bf16.msra.mxu0 %v673_v0  ;;  %1137 = vmatpush.bf16.msra.mxu1 %v673_v0 }
 0x23f   : > { %1138 = vmatpush.bf16.msra.mxu2 %v673_v0  ;;  %1139 = vmatpush.bf16.msra.mxu3 %v673_v0 }
 0x242   : > { %747 = vmatpush.bf16.msra.mxu0 %v672_v3  ;;  %1140 = vmatpush.bf16.msra.mxu1 %v672_v3 }
 0x243   : > { %1141 = vmatpush.bf16.msra.mxu2 %v672_v3  ;;  %1142 = vmatpush.bf16.msra.mxu3 %v672_v3 }
 0x246   : > { %748 = vmatpush.bf16.msra.mxu0 %v671_v6  ;;  %1143 = vmatpush.bf16.msra.mxu1 %v671_v6 }
 0x247   : > { %1144 = vmatpush.bf16.msra.mxu2 %v671_v6  ;;  %1145 = vmatpush.bf16.msra.mxu3 %v671_v6 }
 0x24a   : > { %749 = vmatpush.bf16.msra.mxu0 %v670_v9  ;;  %1146 = vmatpush.bf16.msra.mxu1 %v670_v9 }
 0x24b   : > { %1147 = vmatpush.bf16.msra.mxu2 %v670_v9  ;;  %1148 = vmatpush.bf16.msra.mxu3 %v670_v9 }
 0x24d   : > { %750 = vmatmul.bf16.vlgmr.msra.gmra.mxu0 %v1045_v10  ;;  %760 = vmatmul.bf16.vlgmr.msra.gmra.mxu1 %v1047_v11 }
 0x24e   : > { %770 = vmatmul.bf16.vlgmr.msra.gmra.mxu2 %v1049_v12  ;;  %780 = vmatmul.bf16.vlgmr.msra.gmra.mxu3 %v1051_v13 }
 0x25d   : > { %755 = vmatmul.bf16.gmra.mxu0 %v1046_v14  ;;  %765 = vmatmul.bf16.gmra.mxu1 %v1048_v15 }
 0x25e   : > { %775 = vmatmul.bf16.gmra.mxu2 %v1050_v16  ;;  %785 = vmatmul.bf16.gmra.mxu3 %v1052_v17 }
 0x2ca   : > { %v751_v20 = vpop.f32.mrf.mxu0  ;;  %v761_v21 = vpop.f32.mrf.mxu1 }
 0x2cb   : > { %v752_v22 = vadd.f32 %v751_v20, %v678_v18  ;;  %v762_v23 = vadd.f32 %v761_v21, %v682_v19 }
 0x2cd   : > { %791 = vst [vmem:[#allocation2 + $0x30] sm:$0xff] %v752_v22 }
 0x2ce   : > { %795 = vst [vmem:[#allocation2 + $0x50] sm:$0xff] %v762_v23 }
 0x2d1   : > { %v771_v28 = vpop.f32.mrf.mxu2  ;;  %v781_v29 = vpop.f32.mrf.mxu3 }
 0x2d2   : > { %v772_v30 = vadd.f32 %v771_v28, %v686_v24  ;;  %v782_v31 = vadd.f32 %v781_v29, %v690_v25  ;;  %v753_v32 = vpop.f32.mrf.mxu0  ;;  %v763_v33 = vpop.f32.mrf.mxu1 }
 0x2d3   : > { %v754_v34 = vadd.f32 %v753_v32, %v679_v26  ;;  %v764_v35 = vadd.f32 %v763_v33, %v683_v27 }
 0x2d4   : > { %799 = vst [vmem:[#allocation2 + $0x40] sm:$0xff] %v772_v30  ;;  %v807_v2 = vld [vmem:[#allocation2 + $0x30] sm:$0xff] (%p634_p1) }
 0x2d5   : > { %803 = vst [vmem:[#allocation2 + $0x60] sm:$0xff] %v782_v31  ;;  %v811_v6 = vld [vmem:[#allocation2 + $0x50] sm:$0xff] (%p634_p1) }
 0x2d6   : > { %792 = vst [vmem:[#allocation2] sm:$0xff] %v754_v34 }
 0x2d7   : > { %796 = vst [vmem:[#allocation2 + $0x68] sm:$0xff] %v764_v35 }
 0x2d8   :  { %823 = vst [vmem:[%s1448_s6] sm:$0xff] (%p634_p1), %v807_v2 }
 0x2d9   : > { %v773_v40 = vpop.f32.mrf.mxu2  ;;  %v783_v41 = vpop.f32.mrf.mxu3  ;;  %827 = vst [vmem:[%s1448_s6 + $0x20] sm:$0xff] (%p634_p1), %v811_v6 }
 0x2da   : > { %v774_v42 = vadd.f32 %v773_v40, %v687_v36  ;;  %v784_v43 = vadd.f32 %v783_v41, %v691_v37  ;;  %v756_v44 = vpop.f32.mrf.mxu0  ;;  %v766_v45 = vpop.f32.mrf.mxu1 }
 0x2db   : > { %v757_v46 = vadd.f32 %v756_v44, %v680_v38  ;;  %v767_v47 = vadd.f32 %v766_v45, %v684_v39  ;;  %v815_v10 = vld [vmem:[#allocation2 + $0x40] sm:$0xff] (%p634_p1) }
 0x2dc   : > { %800 = vst [vmem:[#allocation2 + $0x20] sm:$0xff] %v774_v42  ;;  %v819_v14 = vld [vmem:[#allocation2 + $0x60] sm:$0xff] (%p634_p1) }
 0x2dd   : > { %804 = vst [vmem:[#allocation2 + $0x70] sm:$0xff] %v784_v43  ;;  %v808_v3 = vld [vmem:[#allocation2] sm:$0xff] (%p634_p1) }
 0x2de   : > { %793 = vst [vmem:[#allocation2 + $0x58] sm:$0xff] %v757_v46  ;;  %v812_v7 = vld [vmem:[#allocation2 + $0x68] sm:$0xff] (%p634_p1) }
 0x2df   : > { %797 = vst [vmem:[#allocation2 + $0x8] sm:$0xff] %v767_v47 }
 0x2e0   :  { %824 = vst [vmem:[%s1448_s6 + $0x8] sm:$0xff] (%p634_p1), %v808_v3 }
 0x2e1   : > { %v776_v52 = vpop.f32.mrf.mxu2  ;;  %v786_v53 = vpop.f32.mrf.mxu3  ;;  %828 = vst [vmem:[%s1448_s6 + $0x28] sm:$0xff] (%p634_p1), %v812_v7 }
 0x2e2   : > { %v777_v54 = vadd.f32 %v776_v52, %v688_v48  ;;  %v787_v55 = vadd.f32 %v786_v53, %v692_v49  ;;  %v758_v56 = vpop.f32.mrf.mxu0  ;;  %v768_v57 = vpop.f32.mrf.mxu1  ;;  %831 = vst [vmem:[%s1448_s6 + $0x40] sm:$0xff] (%p634_p1), %v815_v10 }
 0x2e3   : > { %v759_v58 = vadd.f32 %v758_v56, %v681_v50  ;;  %v769_v59 = vadd.f32 %v768_v57, %v685_v51  ;;  %v816_v11 = vld [vmem:[#allocation2 + $0x20] sm:$0xff] (%p634_p1)  ;;  %835 = vst [vmem:[%s1448_s6 + $0x60] sm:$0xff] (%p634_p1), %v819_v14 }
 0x2e4   : > { %801 = vst [vmem:[#allocation2 + $0x10] sm:$0xff] %v777_v54  ;;  %v820_v15 = vld [vmem:[#allocation2 + $0x70] sm:$0xff] (%p634_p1) }
 0x2e5   : > { %805 = vst [vmem:[#allocation2 + $0x78] sm:$0xff] %v787_v55  ;;  %v809_v4 = vld [vmem:[#allocation2 + $0x58] sm:$0xff] (%p634_p1) }
 0x2e6   : > { %794 = vst [vmem:[#allocation2 + $0x18] sm:$0xff] %v759_v58  ;;  %v813_v8 = vld [vmem:[#allocation2 + $0x8] sm:$0xff] (%p634_p1) }
 0x2e7   : > { %798 = vst [vmem:[#allocation2 + $0x48] sm:$0xff] %v769_v59 }
 0x2e8   :  { %825 = vst [vmem:[%s1448_s6 + $0x10] sm:$0xff] (%p634_p1), %v809_v4 }
 0x2e9   : > { %v778_v62 = vpop.f32.mrf.mxu2  ;;  %v788_v63 = vpop.f32.mrf.mxu3  ;;  %829 = vst [vmem:[%s1448_s6 + $0x30] sm:$0xff] (%p634_p1), %v813_v8 }
 0x2ea   : > { %v779_v0 = vadd.f32 %v778_v62, %v689_v60  ;;  %v789_v1 = vadd.f32 %v788_v63, %v693_v61  ;;  %636 = sbr.rel (!%p634_p1) target bundleno = 551 (0x227), region = 69  ;;  %832 = vst [vmem:[%s1448_s6 + $0x48] sm:$0xff] (%p634_p1), %v816_v11 }
 0x2eb   :  { %v817_v12 = vld [vmem:[#allocation2 + $0x10] sm:$0xff] (%p634_p1)  ;;  %836 = vst [vmem:[%s1448_s6 + $0x68] sm:$0xff] (%p634_p1), %v820_v15 }
 0x2ec   : > { %802 = vst [vmem:[#allocation2 + $0x38] sm:$0xff] %v779_v0  ;;  %v821_v16 = vld [vmem:[#allocation2 + $0x78] sm:$0xff] (%p634_p1) }
 0x2ed   : > { %806 = vst [vmem:[#allocation2 + $0x28] sm:$0xff] %v789_v1  ;;  %v810_v5 = vld [vmem:[#allocation2 + $0x18] sm:$0xff] (%p634_p1) }
 0x2ee   :  { %826 = vst [vmem:[%s1448_s6 + $0x18] sm:$0xff] (%p634_p1), %v810_v5  ;;  %v814_v9 = vld [vmem:[#allocation2 + $0x48] sm:$0xff] (%p634_p1) }
 0x2ef   :  { %830 = vst [vmem:[%s1448_s6 + $0x38] sm:$0xff] %v814_v9 }
 0x2f0   :  { %833 = vst [vmem:[%s1448_s6 + $0x50] sm:$0xff] %v817_v12 }
 0x2f1   :  { %837 = vst [vmem:[%s1448_s6 + $0x70] sm:$0xff] %v821_v16 }
 0x2f3   :  { %v818_v13 = vld [vmem:[#allocation2 + $0x38] sm:$0xff] }
 0x2f4   :  { %834 = vst [vmem:[%s1448_s6 + $0x58] sm:$0xff] %v818_v13  ;;  %v822_v17 = vld [vmem:[#allocation2 + $0x28] sm:$0xff] }
 0x2f5   :  { %838 = vst [vmem:[%s1448_s6 + $0x78] sm:$0xff] %v822_v17 }

</bundles_post_ra>
